<compile_context>
chip_gen: v7x
topology: tpu7x:2x2x1
jax: 0.10.0
libtpu: 0.0.40
codegen_flags: <defaults>
</compile_context>

<pallas_src>
import jax
import jax.numpy as jnp
from jax.experimental import pallas as pl
from jax.experimental.pallas import tpu as pltpu


def _dpconv_kernel(x_ref, wt_ref, bias_ref, o_ref):
    # x_ref:    (1, C1, T)   slab of contiguous flattened pixels of one image
    # wt_ref:   (C2, C1)     1x1 conv weight with BN scale folded in
    # bias_ref: (C2, 1)      fused bias = (conv_b - mean) * scale + beta (f32)
    # o_ref:    (1, C2, T)   lane-dense output slab
    acc = jnp.dot(wt_ref[...], x_ref[0],
                  preferred_element_type=jnp.float32)       # (C2, T) f32
    y = acc + bias_ref[...]                                 # broadcast (C2, 1)
    # LeakyReLU(negative_slope=0.1)
    o_ref[0] = jnp.where(y > 0, y, 0.1 * y).astype(o_ref.dtype)


def _round_up(v, m):
    return (v + m - 1) // m * m


def dp_conv_forward(x_nchw, w, conv_b, gamma, beta, run_mean, run_var,
                    *, stride=1, eps=1e-5, tile_hw=512, out_dtype=None,
                    vmem_budget_bytes=20 * 1024 * 1024):
    """x_nchw: (N, C1, H, W).  w: (C2, C1) 1x1-conv weight (PyTorch layout,
    kernel dims squeezed).  Returns (N, C2, H_out, W_out)."""
    if stride != 1:
        # TODO(synk): fold the stride subsample into the kernel's DMA pattern
        # (strided index_map) instead of materializing the slice in HBM.
        x_nchw = x_nchw[:, :, ::stride, ::stride]

    n, c1, h, wd = x_nchw.shape
    c2 = w.shape[0]
    hw = h * wd
    out_dtype = out_dtype or x_nchw.dtype

    # Fuse BN (inference) into the weight and a per-channel bias.
    scale = gamma / jnp.sqrt(run_var + eps)                               # (C2,)
    wt = (w.astype(jnp.float32) * scale[:, None]).astype(x_nchw.dtype)    # (C2, C1)
    bias = ((conv_b - run_mean) * scale + beta).astype(jnp.float32)
    bias = bias.reshape(c2, 1)

    # NCHW -> (N, C1, H*W): collapsing the trailing contiguous dims is free.
    x3d = x_nchw.reshape(n, c1, hw)

    # Pad the spatial axis up to a multiple of 128 only if needed.
    hw_p = _round_up(hw, 128)
    if hw_p != hw:
        x3d = jnp.pad(x3d, ((0, 0), (0, 0), (0, hw_p - hw)))

    # Spatial tile: multiple of 128, clamped to the array and a VMEM budget
    # (conservative so double-buffered tiles also fit v7x's smaller VMEM).
    x_bytes = jnp.dtype(x3d.dtype).itemsize
    o_bytes = jnp.dtype(out_dtype).itemsize
    tile = max(128, min(_round_up(tile_hw, 128), hw_p) // 128 * 128)
    while tile > 128:
        need = 2 * tile * (c1 * x_bytes + c2 * o_bytes) + c1 * c2 * x_bytes + 4 * c2
        if need <= vmem_budget_bytes:
            break
        tile -= 128
    need = 2 * tile * (c1 * x_bytes + c2 * o_bytes) + c1 * c2 * x_bytes + 4 * c2
    vmem_limit = int(min(100 * 1024 * 1024, max(2 * need, 32 * 1024 * 1024)))

    grid = (n, pl.cdiv(hw_p, tile))

    out3d = pl.pallas_call(
        _dpconv_kernel,
        out_shape=jax.ShapeDtypeStruct((n, c2, hw_p), out_dtype),
        grid_spec=pltpu.PrefetchScalarGridSpec(
            num_scalar_prefetch=0,
            grid=grid,
            in_specs=[
                pl.BlockSpec((1, c1, tile), lambda b, t: (b, 0, t)),  # x slab
                pl.BlockSpec((c2, c1), lambda b, t: (0, 0)),          # fused weight
                pl.BlockSpec((c2, 1), lambda b, t: (0, 0)),           # fused bias
            ],
            out_specs=pl.BlockSpec((1, c2, tile), lambda b, t: (b, 0, t)),
        ),
        compiler_params=pltpu.CompilerParams(
            dimension_semantics=("parallel", "parallel"),
            vmem_limit_bytes=vmem_limit),
    )(x3d, wt, bias)

    return out3d[:, :, :hw].reshape(n, c2, h, wd)


def _reference(x_nchw, w, conv_b, gamma, beta, run_mean, run_var,
               *, stride=1, eps=1e-5):
    if stride != 1:
        x_nchw = x_nchw[:, :, ::stride, ::stride]
    y = jnp.einsum("nchw,dc->ndhw", x_nchw.astype(jnp.float32),
                   w.astype(jnp.float32)) + conv_b[None, :, None, None]
    y = (y - run_mean[None, :, None, None]) / jnp.sqrt(
        run_var[None, :, None, None] + eps)
    y = y * gamma[None, :, None, None] + beta[None, :, None, None]
    return jnp.where(y > 0, y, 0.1 * y)


if __name__ == "__main__":
    key = jax.random.PRNGKey(0)
    k_x, k_w, k_b, k_g, k_be, k_m, k_v = jax.random.split(key, 7)

    N, C1, H, W = 2, 4, 16, 16   # input (NCHW)
    C2 = 8                       # output channels

    x = jax.random.normal(k_x, (N, C1, H, W), dtype=jnp.float32)
    w = jax.random.normal(k_w, (C2, C1), dtype=jnp.float32) * 0.1   # 1x1 conv weight
    conv_b = jax.random.normal(k_b, (C2,), dtype=jnp.float32) * 0.1
    gamma = 1.0 + 0.1 * jax.random.normal(k_g, (C2,), dtype=jnp.float32)
    beta = 0.1 * jax.random.normal(k_be, (C2,), dtype=jnp.float32)
    run_mean = 0.1 * jax.random.normal(k_m, (C2,), dtype=jnp.float32)
    run_var = jnp.abs(1.0 + 0.1 * jax.random.normal(k_v, (C2,), dtype=jnp.float32))

    # f32 path, stride = 1
    out = jax.block_until_ready(
        dp_conv_forward(x, w, conv_b, gamma, beta, run_mean, run_var))
    ref = _reference(x, w, conv_b, gamma, beta, run_mean, run_var)
    assert out.shape == (N, C2, H, W)
    assert jnp.allclose(out, ref, atol=1e-4, rtol=1e-4), "f32 mismatch"

    # stride = 2 (exercises the spatial-padding path: H*W/4 = 64 -> 128)
    out_s2 = jax.block_until_ready(
        dp_conv_forward(x, w, conv_b, gamma, beta, run_mean, run_var, stride=2))
    ref_s2 = _reference(x, w, conv_b, gamma, beta, run_mean, run_var, stride=2)
    assert out_s2.shape == (N, C2, H // 2, W // 2)
    assert jnp.allclose(out_s2, ref_s2, atol=1e-4, rtol=1e-4), "stride-2 mismatch"

    # bf16 streaming path (halves HBM bytes of the dominant x/out streams;
    # accumulation stays f32 inside the kernel).
    out_bf16 = jax.block_until_ready(
        dp_conv_forward(x.astype(jnp.bfloat16), w, conv_b, gamma, beta,
                        run_mean, run_var))
    assert out_bf16.dtype == jnp.bfloat16
    assert jnp.allclose(out_bf16.astype(jnp.float32), ref,
                        atol=5e-2, rtol=5e-2), "bf16 mismatch"

    print("KERNEL_OK")
</pallas_src>

<mosaic_0001>
module attributes {stable_mosaic.version = 11 : i64} {
  func.func @_dpconv_kernel(%arg0: i32, %arg1: i32, %arg2: memref<1x4x256xf32, #tpu.memory_space<vmem>>, %arg3: memref<8x4xf32, #tpu.memory_space<vmem>>, %arg4: memref<8x1xf32, #tpu.memory_space<vmem>>, %arg5: memref<1x8x256xf32, #tpu.memory_space<vmem>>) attributes {dimension_semantics = [#tpu.dimension_semantics<parallel>, #tpu.dimension_semantics<parallel>], iteration_bounds = array<i64: 2, 1>, scalar_prefetch = 0 : i64, scratch_operands = 0 : i64, tpu.core_type = #tpu.core_type<tc>, window_params = [{transform_indices = @transform_0, window_bounds = array<i64: 1, 4, 256>}, {pipeline_mode = #tpu.pipeline_mode<synchronous>, transform_indices = @transform_1, window_bounds = array<i64: 8, 4>}, {pipeline_mode = #tpu.pipeline_mode<synchronous>, transform_indices = @transform_2, window_bounds = array<i64: 8, 1>}, {transform_indices = @transform_3, window_bounds = array<i64: 1, 8, 256>}]} {
    %c0 = arith.constant 0 : index
    %c0_0 = arith.constant 0 : index
    %0 = vector.load %arg3[%c0, %c0_0] : memref<8x4xf32, #tpu.memory_space<vmem>>, vector<8x4xf32>
    %c0_1 = arith.constant 0 : index
    %c0_2 = arith.constant 0 : index
    %c0_3 = arith.constant 0 : index
    %1 = vector.load %arg2[%c0_1, %c0_2, %c0_3] : memref<1x4x256xf32, #tpu.memory_space<vmem>>, vector<1x4x256xf32>
    %2 = vector.shape_cast %1 : vector<1x4x256xf32> to vector<4x256xf32>
    %cst = arith.constant dense<0.000000e+00> : vector<8x256xf32>
    %3 = tpu.matmul %0, %2, %cst {dimension_numbers = #tpu.dot_dimension_numbers<[1], [0], [0], [1], [0, 0, 1, 1], [], []>} : vector<8x4xf32>, vector<4x256xf32>, vector<8x256xf32> -> vector<8x256xf32>
    %c0_4 = arith.constant 0 : index
    %c0_5 = arith.constant 0 : index
    %4 = vector.load %arg4[%c0_4, %c0_5] : memref<8x1xf32, #tpu.memory_space<vmem>>, vector<8x1xf32>
    %5 = vector.broadcast %4 : vector<8x1xf32> to vector<8x256xf32>
    %6 = arith.addf %3, %5 : vector<8x256xf32>
    %cst_6 = arith.constant 0.000000e+00 : f32
    %7 = vector.broadcast %cst_6 : f32 to vector<8x256xf32>
    %8 = arith.cmpf ogt, %6, %7 : vector<8x256xf32>
    %cst_7 = arith.constant 1.000000e-01 : f32
    %9 = vector.broadcast %cst_7 : f32 to vector<8x256xf32>
    %10 = arith.mulf %9, %6 : vector<8x256xf32>
    %11 = arith.select %8, %6, %10 : vector<8x256xi1>, vector<8x256xf32>
    %c0_8 = arith.constant 0 : index
    %c0_9 = arith.constant 0 : index
    %c0_10 = arith.constant 0 : index
    %12 = vector.load %arg5[%c0_8, %c0_9, %c0_10] : memref<1x8x256xf32, #tpu.memory_space<vmem>>, vector<1x8x256xf32>
    %13 = vector.shape_cast %12 : vector<1x8x256xf32> to vector<8x256xf32>
    %14 = vector.shape_cast %11 : vector<8x256xf32> to vector<1x8x256xf32>
    tpu.vector_store %arg5[%c0_8, %c0_9, %c0_10], %14 {strides = array<i32>} : memref<1x8x256xf32, #tpu.memory_space<vmem>>, vector<1x8x256xf32>,
    return
  }
  func.func @transform_0(%arg0: i32, %arg1: i32) -> (i32, i32, i32) {
    %c0_i32 = arith.constant 0 : i32
    %c0_i32_0 = arith.constant 0 : i32
    return %arg0, %c0_i32, %arg1 : i32, i32, i32
  }
  func.func @transform_1(%arg0: i32, %arg1: i32) -> (i32, i32) {
    %c0_i32 = arith.constant 0 : i32
    %c0_i32_0 = arith.constant 0 : i32
    %c0_i32_1 = arith.constant 0 : i32
    return %c0_i32, %c0_i32_0 : i32, i32
  }
  func.func @transform_2(%arg0: i32, %arg1: i32) -> (i32, i32) {
    %c0_i32 = arith.constant 0 : i32
    %c0_i32_0 = arith.constant 0 : i32
    %c0_i32_1 = arith.constant 0 : i32
    return %c0_i32, %c0_i32_0 : i32, i32
  }
  func.func @transform_3(%arg0: i32, %arg1: i32) -> (i32, i32, i32) {
    %c0_i32 = arith.constant 0 : i32
    %c0_i32_0 = arith.constant 0 : i32
    return %arg0, %c0_i32, %arg1 : i32, i32, i32
  }
}

</mosaic_0001>

<bundles_post_ra>
// kernel: tpu_custom_call.1
= control target key start
LH: loop header
LB: loop body
LE: loop exit
PB: predicated region body
PF: predicated region fallthrough
CT: control target
= control target key end

     0   :  { %8 = vsyncpa [#allocation3], 0  ;;  %s689_s0 = inlined_call_operand.vmem [shape: f32[2,4,256], index: 0, kind: input, shape index: {}]   ;;  %s690_s1 = inlined_call_operand.vmem [shape: f32[8,4], index: 1, kind: input, shape index: {}]   ;;  %s691_s2 = inlined_call_operand.vmem [shape: f32[8,1], index: 2, kind: input, shape index: {}]   ;;  %s692_s3 = inlined_call_operand.hbm [shape: f32[2,8,256], index: 3, kind: output, shape index: {}]  }
   0x1   :  { %10 = vsyncpa [#allocation3 + $0x1], 0  ;;  %s571_s12 = smov 0   ;;  %s573_s13 = smov 0  }
   0x2   :  { %s575_s14 = smov 0   ;;  %s577_s15 = smov 0  }
   0x3   :  { %s579_s16 = smov 0   ;;  %s581_s17 = smov 0  }
   0x4 LB: > { %s391_s18 = sadd.s32 4294967295, %s546_s17   ;;  %s392_s19 = sadd.s32 4294967294, %s546_s17   ;;  %s546_s17 = sphi %s581_s17, %s16_s17   ;;  %s542_s16 = sphi %s579_s16, %s699_s16   ;;  %s538_s15 = sphi %s577_s15, %s698_s15   ;;  %s534_s14 = sphi %s575_s14, %s697_s14   ;;  %s530_s13 = sphi %s573_s13, %s696_s13   ;;  %s526_s12 = sphi %s571_s12, %s695_s12  }
   0x5   : > { %s28_s20 = sadd.s32 1, %s542_s16  ;;  %s107_s21 = sadd.s32 1, %s534_s14 }
   0x6   : > { %p30_p0 = scmp.ge.s32.totalorder %s28_s20, 2  ;;  %p117_p1 = scmp.ne.s32.totalorder %s534_s14, %s530_s13 }
   0x7   : > { %p118_p2 = scmp.eq.s32.totalorder %s391_s18, 1  ;;  %p123_p3 = scmp.ne.s32.totalorder %s530_s13, %s526_s12 }
   0x8   : > { %s701_s20 = smov (%p30_p0, %s28_s20), 0  ;;  %p124_p5 = scmp.eq.s32.totalorder %s392_s19, 1 }
   0x9   : > { %p611_p4 = por %p118_p2, %p117_p1  ;;  %s102_s23 = ssub.s32 %s542_s16, %s701_s20 }
   0xa   : > { %p395_p6 = scmp.ge.s32.totalorder %s546_s17, 1  ;;  %p105_p7 = scmp.eq.s32.totalorder %s102_s23, 0 }
   0xb   : > { %p618_p8 = por %p124_p5, %p123_p3  ;;  %p161_p9 = scmp.lt.s32.totalorder %s546_s17, 3 }
   0xc   : > { %s624_s25 = scalar_select %p105_p7, %s534_s14, %s107_s21  }
   0xd   : > { %p162_p10 = pnand %p395_p6, %p161_p9 }
   0xe   : > { %p190_p11 = scmp.lt.s32.totalorder (!%p162_p10), %s538_s15, 1  ;;  %v548_v0 = vmov (!%p162_p10), 0.0   ;;  %v549_v1 = vmov (!%p162_p10), 0   ;;  %v202_v2 = vld [vmem:[%s691_s2] sm:$0xff] (!%p162_p10)  ;;  %vm214_vm0 = vcmask (!%p162_p10), 1043456   ;;  %vm210_vm1 = vcmask (!%p162_p10), 31744  }
   0xf   : > { %165 = sbr.rel (%p162_p10) target bundleno = 263 (0x107), region = 32  ;;  %283 = vmatprep.mubr.f32.mxu0 (!%p162_p10), %v548_v0  ;;  %466 = vset.pattern.permute.xlu0 (!%p162_p10), %v549_v1  ;;  %v200_v5 = vld [vmem:[%s690_s1] sm:$0xff] (!%p162_p10)  ;;  %s186_s8 = sand.u32 (!%p162_p10), 1, %s530_s13  }
  0x10   : > { %205 = vperm.xlu0 (!%p162_p10), %466, %v202_v2   ;;  %s396_s9 = sshll.u32 (!%p162_p10), %s186_s8, 4  ;;  %s408_s10 = sshll.u32 (!%p162_p10), %s538_s15, 8 }
  0x11   : > { %s188_s11 = scalar_lea.vmem (!%p162_p10), [#allocation2], %s396_s9  ;;  %s642_s23 = scalar_lea.hbm (!%p162_p10), %s692_s3, %s408_s10 }
  0x12   : > { %s315_s18 = sshll.u32 (!%p162_p10), %s188_s11, 4  ;;  %s550_s27 = smov (!%p162_p10), [#allocation2]   ;;  %s644_s18 = int_to_ptr.vmem [resolvable:$true] %s315_s18 }
  0x13   : > { %s468_s26 = scalar_lea.vmem (!%p162_p10), %s644_s18, 256 }
  0x14   : > { %p469_p12 = scmp.ne.s32.totalorder (!%p162_p10), %s644_s18, %s468_s26 }
  0x16   : > { %s191_s28 = scalar_select %p190_p11, %s538_s15, 1 }
  0x17   : > { %s299_s15 = scalar_lea.sflag [#allocation3], %s186_s8  ;;  %p470_p13 = pnand %p469_p12, %p611_p4 }
  0x18   : > { %s407_s29 = sshll.u32 %s191_s28, 3  ;;  %s472_s28 = sshll.u32 %s550_s27, 4  ;;  %s473_s28 = int_to_ptr.vmem [resolvable:$false] %s472_s28 }
  0x19   : > { %s197_s5 = scalar_lea.vmem %s689_s0, %s407_s29  ;;  %p471_p0 = pneg %p470_p13 }
  0x1a   : > { %v201_v3 = vld [vmem:[%s197_s5] sm:$0xff]  ;;  %s474_s29 = scalar_lea.vmem %s473_s28, 512  ;;  %p475_p1 = scmp.lt.s32.totalorder %s644_s18, %s473_s28 }
  0x1b   : > { %v209_v4 = vcombine.high %v201_v3, %v201_v3  ;;  %p476_p2 = scmp.lt.s32.totalorder %s474_s29, %s468_s26 }
  0x1d   : > { %399 = vmatprep.subr.msk.mxu0 %vm214_vm0, %v209_v4  ;;  %p477_p3 = por %p476_p2, %p475_p1 }
  0x1e   : > { %400 = vmatpush1.msk.msra.mxu0 %vm214_vm0, %v201_v3 }
  0x1f   : > { %401 = vmatmul.mubr.msk.f32.vlgmr.msra.gmra.mrb[0].mxu0 %vm210_vm1, %v200_v5  ;;  %p478_p5 = pnand %p477_p3, %p471_p0 }
  0x8f   : > { %v206_v6 = vpop.permute.xlu0 %205 }
  0xf2   : > { %v285_v7 = vpop.f32.mrb[0].mxu0 }
  0xf3   : > { %v286_v8 = vadd.f32 %v285_v7, %v206_v6  ;;  %v287_v9 = vpop.f32.mrb[1].mxu0 }
  0xf4   : > { %v288_v10 = vadd.f32 %v287_v9, %v206_v6 }
  0xf5   : > { %vm290_vm2 = vcmp.gt.f32.partialorder %v286_v8, 0.0  ;;  %v292_v11 = vmul.f32 0.1, %v286_v8 }
  0xf6   : > { %vm291_vm3 = vcmp.gt.f32.partialorder %v288_v10, 0.0  ;;  %v293_v12 = vmul.f32 0.1, %v288_v10 }
  0xf7   : > { %v294_v13 = vsel %vm290_vm2, %v286_v8, %v292_v11 }
  0xf8   : > { %v295_v14 = vsel %vm291_vm3, %v288_v10, %v293_v12  ;;  %296 = vst [vmem:[%s188_s11] sm:$0xff] %v294_v13 }
  0xf9   : > { %297 = vst [vmem:[%s188_s11 + $0x8] sm:$0xff] %v295_v14 }
  0xfa   : > { %481 = shalt.err (!%p478_p5)
}
  0xfb   : > { %s482_s30 = scalar_lea.hbm %s642_s23, 256  ;;  %s486_s6 = scalar_lea.hbm %s692_s3, 512 }
  0xfc   : > { %p483_p6 = scmp.ne.s32.totalorder %s642_s23, %s482_s30  ;;  %p487_p10 = scmp.lt.u32.totalorder %s642_s23, %s692_s3 }
  0xfd   : > { %p488_p11 = scmp.lt.u32.totalorder %s486_s6, %s482_s30  ;;  %p490_p13 = scmp.lt.u32.totalorder %s482_s30, %s642_s23 }
  0xfe   : > { %p484_p7 = pnand %p483_p6, %p611_p4 }
  0xff   : > { %p489_p12 = por %p488_p11, %p487_p10 }
 0x100   : > { %p485_p9 = pneg %p484_p7 }
 0x101   : > { %p491_p0 = por %p490_p13, %p489_p12 }
 0x103   : > { %p492_p1 = pnand %p491_p0, %p485_p9 }
 0x105   : > { %495 = shalt.err (!%p492_p1)
}
 0x106   : > { %409 = dma.vmem_to_hbm [thread:$0]  (%p611_p4), %s644_s18, 256, %s642_s23, %s299_s15  }
 0x107 PF: > { %p415_p2 = scmp.ge.s32.totalorder %s546_s17, 2  ;;  %s327_s9 = sand.u32 1, %s526_s12  }
 0x108   : > { %s328_s10 = scalar_lea.sflag [#allocation3], %s327_s9 }
 0x109   : > { %p412_p3 = pnand %p415_p2, %p618_p8 }
 0x10b   : > { %521 = dma.done.wait (!%p412_p3), %s328_s10, 256  }
 0x10c   : > { %523 = vsyncadd (!%p412_p3), %s328_s10, 4294967040  ;;  %s16_s17 = sadd.s32 1, %s546_s17   ;;  %s695_s12 = smov %s530_s13 }
 0x10d   : > { %p13_p5 = scmp.ge.s32.totalorder %s16_s17, 4   ;;  %s696_s13 = smov %s534_s14 }
 0x10e   : > { %s697_s14 = smov %s624_s25  ;;  %s698_s15 = smov %s542_s16 }
 0x10f   : > { %s699_s16 = smov %s701_s20  ;;  %15 = sbr.rel (!%p13_p5) target bundleno = 4 (0x4), region = 67 }
 0x116   :  { %333 = vsyncpa [#allocation3], 1 }
 0x117   :  { %335 = vsyncpa [#allocation3 + $0x1], 1 }

</bundles_post_ra>
